<compile_context>
chip_gen: v7x
topology: tpu7x:2x2x1
jax: 0.10.0
libtpu: 0.0.40
codegen_flags: <defaults>
</compile_context>

<pallas_src>
import numpy as np
import jax
import jax.numpy as jnp
from jax.experimental import pallas as pl
from jax.experimental.pallas import tpu as pltpu


def _make_kernel(C):
    def kernel(side_ref, w_ref, xn_ref, out_ref, acc_ref):
        # side_ref: SMEM (N, 2+C): [a, b, bias+temb_0 .. bias+temb_{C-1}]
        # w_ref:    SMEM (C, C)   1x1-conv weight (compact, no padding)
        # xn_ref:   VMEM (1, 2C, hw_tile): rows 0..C-1 = x, rows C..2C-1 = noise
        # out_ref:  VMEM (1, 8, 128) per-sample SSE (broadcast into the tile)
        # acc_ref:  VMEM (1, hw_tile) elementwise SSE accumulator
        n = pl.program_id(0)
        h = pl.program_id(1)

        @pl.when(h == 0)
        def _():
            acc_ref[...] = jnp.zeros_like(acc_ref)

        a = side_ref[n, 0]                       # sqrt_alphas_cumprod[t_n]
        b = side_ref[n, 1]                       # sqrt(1 - alphas_cumprod[t_n])

        blk = xn_ref[0].astype(jnp.float32)      # (2C, hw_tile), upcast if bf16
        x_rows = [blk[c:c + 1, :] for c in range(C)]          # x channels
        n_rows = [blk[C + c:C + c + 1, :] for c in range(C)]  # noise channels

        # q(x_t | x_0): perturb_x  (pure VPU, scalar-broadcast FMAs)
        p_rows = [a * x_rows[c] + b * n_rows[c] for c in range(C)]

        # synthetic eps-model: unrolled VPU channel mix + bias/time-emb add,
        # then elementwise squared-error accumulation (no per-step XLU reduce).
        sq = None
        for o in range(C):
            eh = w_ref[o, 0] * p_rows[0]
            for c in range(1, C):
                eh = eh + w_ref[o, c] * p_rows[c]
            eh = eh + side_ref[n, 2 + o]         # bias + temb[t_n, o]
            d = eh - n_rows[o]
            sq = d * d if sq is None else sq + d * d

        acc_ref[...] += sq                       # (1, hw_tile) f32 partials

        @pl.when(h == pl.num_programs(1) - 1)
        def _():
            sse = jnp.sum(acc_ref[...])          # single cross-lane reduce
            out_ref[...] = jnp.broadcast_to(sse, out_ref.shape)

    return kernel


def _pick_hw_tile(HW):
    # >=512-lane tiles when the spatial extent allows it (HBM-roofline sweet
    # spot); fall back to the full extent for small / irregular images.
    for cand in (2048, 1024, 512, 256, 128):
        if HW % cand == 0:
            return cand
    return HW


def gaussian_diffusion_loss(x, t, noise, sqrt_alphas_cumprod,
                            sqrt_one_minus_alphas_cumprod, w, bias, temb_table):
    """Scalar l2 diffusion loss (perturb + eps-model + MSE) fused on TPU."""
    N, C, H, W = x.shape
    HW = H * W
    hw_tile = _pick_hw_tile(HW)
    num_hw = HW // hw_tile

    # Stack x and noise along the channel axis: one operand, one DMA stream,
    # full 8-sublane blocks.  Input dtype is preserved (bf16 OK at scale; the
    # kernel upcasts to f32 for all arithmetic and accumulation).
    xn = jnp.concatenate([x.reshape(N, C, HW), noise.reshape(N, C, HW)], axis=1)

    # Per-sample scalars packed for SMEM: [a, b, bias+temb_0 .. bias+temb_{C-1}]
    a = sqrt_alphas_cumprod[t].astype(jnp.float32)
    b = sqrt_one_minus_alphas_cumprod[t].astype(jnp.float32)
    bt = temb_table[t].astype(jnp.float32) + bias.astype(jnp.float32)[None, :]
    side = jnp.concatenate([a[:, None], b[:, None], bt], axis=1)     # (N, 2+C)
    w_f = w.astype(jnp.float32)                                      # (C, C)

    inv_total = 1.0 / float(N * C * HW)

    flops = int(N * HW * C * (2 * C + 6))
    bytes_accessed = int(xn.size * xn.dtype.itemsize + N * 8 * 128 * 4)

    partial = pl.pallas_call(
        _make_kernel(C),
        out_shape=jax.ShapeDtypeStruct((N, 8, 128), jnp.float32),
        grid_spec=pltpu.PrefetchScalarGridSpec(
            num_scalar_prefetch=0,
            grid=(N, num_hw),                # batch parallel, HW reduction last
            in_specs=[
                pl.BlockSpec(memory_space=pltpu.SMEM),            # side (N, 2+C)
                pl.BlockSpec(memory_space=pltpu.SMEM),            # w    (C, C)
                pl.BlockSpec((1, 2 * C, hw_tile), lambda n, h: (n, 0, h)),
            ],
            out_specs=pl.BlockSpec((1, 8, 128), lambda n, h: (n, 0, 0)),
            scratch_shapes=[pltpu.VMEM((1, hw_tile), jnp.float32)],
        ),
        compiler_params=pltpu.CompilerParams(
            dimension_semantics=("parallel", "arbitrary")),
        cost_estimate=pl.CostEstimate(
            flops=flops, transcendentals=0, bytes_accessed=bytes_accessed),
    )(side, w_f, xn)

    # Tiny N-length final reduce + mean normalization stay in the wrapper.
    return jnp.sum(partial[:, 0, 0]) * jnp.float32(inv_total)


if __name__ == "__main__":
    # ---- deterministic diffusion schedule (buffers from __init__) ----
    T = 10
    betas = np.linspace(1e-4, 0.02, T, dtype=np.float64)
    alphas = 1.0 - betas
    alphas_cumprod = np.cumprod(alphas)
    sqrt_alphas_cumprod = jnp.asarray(np.sqrt(alphas_cumprod), dtype=jnp.float32)
    sqrt_one_minus_alphas_cumprod = jnp.asarray(np.sqrt(1.0 - alphas_cumprod),
                                                dtype=jnp.float32)

    # ---- small shapes consistent with forward: (N, img_channels, H, W) ----
    N, C, H, W = 2, 4, 16, 16
    key = jax.random.PRNGKey(0)
    kx, kt, kn, kw, ke = jax.random.split(key, 5)

    x = jax.random.normal(kx, (N, C, H, W), dtype=jnp.float32)
    t = jax.random.randint(kt, (N,), 0, T)                   # forward()'s t draw
    noise = jax.random.normal(kn, (N, C, H, W), dtype=jnp.float32)

    # ---- deterministic synthetic model parameters (noise predictor) ----
    # TODO(synk): the real denoiser is a user-supplied nn.Module; a 1x1-conv +
    # time-embedding stand-in is used here.
    w_conv = 0.1 * jax.random.normal(kw, (C, C), dtype=jnp.float32)
    bias_conv = jnp.zeros((C,), dtype=jnp.float32)
    temb_table = 0.1 * jax.random.normal(ke, (T, C), dtype=jnp.float32)

    loss = gaussian_diffusion_loss(x, t, noise, sqrt_alphas_cumprod,
                                   sqrt_one_minus_alphas_cumprod,
                                   w_conv, bias_conv, temb_table)
    loss = jax.block_until_ready(loss)

    # pure-JAX reference for the same forward pass
    x_r = x.reshape(N, C, H * W)
    noise_r = noise.reshape(N, C, H * W)
    a = sqrt_alphas_cumprod[t][:, None, None]
    b = sqrt_one_minus_alphas_cumprod[t][:, None, None]
    perturbed = a * x_r + b * noise_r
    eps_ref = (jnp.einsum("oc,ncs->nos", w_conv, perturbed)
               + bias_conv[None, :, None] + temb_table[t][:, :, None])
    loss_ref = jnp.mean((eps_ref - noise_r) ** 2)

    assert np.allclose(np.asarray(loss), np.asarray(loss_ref), rtol=1e-5, atol=1e-5), (
        float(loss), float(loss_ref))
    print("KERNEL_OK")
</pallas_src>

<mosaic_0001>
module attributes {stable_mosaic.version = 11 : i64} {
  func.func @kernel(%arg0: i32, %arg1: i32, %arg2: memref<2x6xf32, #tpu.memory_space<smem>>, %arg3: memref<4x4xf32, #tpu.memory_space<smem>>, %arg4: memref<1x8x256xf32, #tpu.memory_space<vmem>>, %arg5: memref<1x8x128xf32, #tpu.memory_space<vmem>>, %arg6: memref<1x256xf32, #tpu.memory_space<vmem>>) attributes {dimension_semantics = [#tpu.dimension_semantics<parallel>, #tpu.dimension_semantics<arbitrary>], iteration_bounds = array<i64: 2, 1>, scalar_prefetch = 0 : i64, scratch_operands = 1 : i64, tpu.core_type = #tpu.core_type<tc>, window_params = [{transform_indices = @transform_0, window_bounds = array<i64: 2, 6>}, {transform_indices = @transform_1, window_bounds = array<i64: 4, 4>}, {transform_indices = @transform_2, window_bounds = array<i64: 1, 8, 256>}, {transform_indices = @transform_3, window_bounds = array<i64: 1, 8, 128>}]} {
    %c0_i32 = arith.constant 0 : i32
    %0 = arith.cmpi eq, %arg1, %c0_i32 : i32
    %1 = arith.extui %0 : i1 to i32
    %c0_i32_0 = arith.constant 0 : i32
    %2 = arith.cmpi ne, %1, %c0_i32_0 : i32
    scf.if %2 {
      %cst = arith.constant 0.000000e+00 : f32
      %130 = vector.broadcast %cst : f32 to vector<1x256xf32>
      %c0_42 = arith.constant 0 : index
      %c0_43 = arith.constant 0 : index
      %131 = vector.load %arg6[%c0_42, %c0_43] : memref<1x256xf32, #tpu.memory_space<vmem>>, vector<1x256xf32>
      tpu.vector_store %arg6[%c0_42, %c0_43], %130 {strides = array<i32>} : memref<1x256xf32, #tpu.memory_space<vmem>>, vector<1x256xf32>,
    } else {
    }
    %3 = arith.index_cast %arg0 : i32 to index
    %c0 = arith.constant 0 : index
    %4 = memref.load %arg2[%3, %c0] : memref<2x6xf32, #tpu.memory_space<smem>>
    %5 = arith.index_cast %arg0 : i32 to index
    %c1 = arith.constant 1 : index
    %6 = memref.load %arg2[%5, %c1] : memref<2x6xf32, #tpu.memory_space<smem>>
    %c0_1 = arith.constant 0 : index
    %c0_2 = arith.constant 0 : index
    %c0_3 = arith.constant 0 : index
    %7 = vector.load %arg4[%c0_1, %c0_2, %c0_3] : memref<1x8x256xf32, #tpu.memory_space<vmem>>, vector<1x8x256xf32>
    %8 = vector.shape_cast %7 : vector<1x8x256xf32> to vector<8x256xf32>
    %9 = vector.extract_strided_slice %8 {offsets = [0, 0], sizes = [1, 256], strides = [1, 1]} : vector<8x256xf32> to vector<1x256xf32>
    %10 = vector.extract_strided_slice %8 {offsets = [1, 0], sizes = [1, 256], strides = [1, 1]} : vector<8x256xf32> to vector<1x256xf32>
    %11 = vector.extract_strided_slice %8 {offsets = [2, 0], sizes = [1, 256], strides = [1, 1]} : vector<8x256xf32> to vector<1x256xf32>
    %12 = vector.extract_strided_slice %8 {offsets = [3, 0], sizes = [1, 256], strides = [1, 1]} : vector<8x256xf32> to vector<1x256xf32>
    %13 = vector.extract_strided_slice %8 {offsets = [4, 0], sizes = [1, 256], strides = [1, 1]} : vector<8x256xf32> to vector<1x256xf32>
    %14 = vector.extract_strided_slice %8 {offsets = [5, 0], sizes = [1, 256], strides = [1, 1]} : vector<8x256xf32> to vector<1x256xf32>
    %15 = vector.extract_strided_slice %8 {offsets = [6, 0], sizes = [1, 256], strides = [1, 1]} : vector<8x256xf32> to vector<1x256xf32>
    %16 = vector.extract_strided_slice %8 {offsets = [7, 0], sizes = [1, 256], strides = [1, 1]} : vector<8x256xf32> to vector<1x256xf32>
    %17 = vector.broadcast %4 : f32 to vector<1x256xf32>
    %18 = arith.mulf %17, %9 : vector<1x256xf32>
    %19 = vector.broadcast %6 : f32 to vector<1x256xf32>
    %20 = arith.mulf %19, %13 : vector<1x256xf32>
    %21 = arith.addf %18, %20 : vector<1x256xf32>
    %22 = vector.broadcast %4 : f32 to vector<1x256xf32>
    %23 = arith.mulf %22, %10 : vector<1x256xf32>
    %24 = vector.broadcast %6 : f32 to vector<1x256xf32>
    %25 = arith.mulf %24, %14 : vector<1x256xf32>
    %26 = arith.addf %23, %25 : vector<1x256xf32>
    %27 = vector.broadcast %4 : f32 to vector<1x256xf32>
    %28 = arith.mulf %27, %11 : vector<1x256xf32>
    %29 = vector.broadcast %6 : f32 to vector<1x256xf32>
    %30 = arith.mulf %29, %15 : vector<1x256xf32>
    %31 = arith.addf %28, %30 : vector<1x256xf32>
    %32 = vector.broadcast %4 : f32 to vector<1x256xf32>
    %33 = arith.mulf %32, %12 : vector<1x256xf32>
    %34 = vector.broadcast %6 : f32 to vector<1x256xf32>
    %35 = arith.mulf %34, %16 : vector<1x256xf32>
    %36 = arith.addf %33, %35 : vector<1x256xf32>
    %c0_4 = arith.constant 0 : index
    %c0_5 = arith.constant 0 : index
    %37 = memref.load %arg3[%c0_4, %c0_5] : memref<4x4xf32, #tpu.memory_space<smem>>
    %38 = vector.broadcast %37 : f32 to vector<1x256xf32>
    %39 = arith.mulf %38, %21 : vector<1x256xf32>
    %c0_6 = arith.constant 0 : index
    %c1_7 = arith.constant 1 : index
    %40 = memref.load %arg3[%c0_6, %c1_7] : memref<4x4xf32, #tpu.memory_space<smem>>
    %41 = vector.broadcast %40 : f32 to vector<1x256xf32>
    %42 = arith.mulf %41, %26 : vector<1x256xf32>
    %43 = arith.addf %39, %42 : vector<1x256xf32>
    %c0_8 = arith.constant 0 : index
    %c2 = arith.constant 2 : index
    %44 = memref.load %arg3[%c0_8, %c2] : memref<4x4xf32, #tpu.memory_space<smem>>
    %45 = vector.broadcast %44 : f32 to vector<1x256xf32>
    %46 = arith.mulf %45, %31 : vector<1x256xf32>
    %47 = arith.addf %43, %46 : vector<1x256xf32>
    %c0_9 = arith.constant 0 : index
    %c3 = arith.constant 3 : index
    %48 = memref.load %arg3[%c0_9, %c3] : memref<4x4xf32, #tpu.memory_space<smem>>
    %49 = vector.broadcast %48 : f32 to vector<1x256xf32>
    %50 = arith.mulf %49, %36 : vector<1x256xf32>
    %51 = arith.addf %47, %50 : vector<1x256xf32>
    %52 = arith.index_cast %arg0 : i32 to index
    %c2_10 = arith.constant 2 : index
    %53 = memref.load %arg2[%52, %c2_10] : memref<2x6xf32, #tpu.memory_space<smem>>
    %54 = vector.broadcast %53 : f32 to vector<1x256xf32>
    %55 = arith.addf %51, %54 : vector<1x256xf32>
    %56 = arith.subf %55, %13 : vector<1x256xf32>
    %57 = arith.mulf %56, %56 : vector<1x256xf32>
    %c1_11 = arith.constant 1 : index
    %c0_12 = arith.constant 0 : index
    %58 = memref.load %arg3[%c1_11, %c0_12] : memref<4x4xf32, #tpu.memory_space<smem>>
    %59 = vector.broadcast %58 : f32 to vector<1x256xf32>
    %60 = arith.mulf %59, %21 : vector<1x256xf32>
    %c1_13 = arith.constant 1 : index
    %c1_14 = arith.constant 1 : index
    %61 = memref.load %arg3[%c1_13, %c1_14] : memref<4x4xf32, #tpu.memory_space<smem>>
    %62 = vector.broadcast %61 : f32 to vector<1x256xf32>
    %63 = arith.mulf %62, %26 : vector<1x256xf32>
    %64 = arith.addf %60, %63 : vector<1x256xf32>
    %c1_15 = arith.constant 1 : index
    %c2_16 = arith.constant 2 : index
    %65 = memref.load %arg3[%c1_15, %c2_16] : memref<4x4xf32, #tpu.memory_space<smem>>
    %66 = vector.broadcast %65 : f32 to vector<1x256xf32>
    %67 = arith.mulf %66, %31 : vector<1x256xf32>
    %68 = arith.addf %64, %67 : vector<1x256xf32>
    %c1_17 = arith.constant 1 : index
    %c3_18 = arith.constant 3 : index
    %69 = memref.load %arg3[%c1_17, %c3_18] : memref<4x4xf32, #tpu.memory_space<smem>>
    %70 = vector.broadcast %69 : f32 to vector<1x256xf32>
    %71 = arith.mulf %70, %36 : vector<1x256xf32>
    %72 = arith.addf %68, %71 : vector<1x256xf32>
    %73 = arith.index_cast %arg0 : i32 to index
    %c3_19 = arith.constant 3 : index
    %74 = memref.load %arg2[%73, %c3_19] : memref<2x6xf32, #tpu.memory_space<smem>>
    %75 = vector.broadcast %74 : f32 to vector<1x256xf32>
    %76 = arith.addf %72, %75 : vector<1x256xf32>
    %77 = arith.subf %76, %14 : vector<1x256xf32>
    %78 = arith.mulf %77, %77 : vector<1x256xf32>
    %79 = arith.addf %57, %78 : vector<1x256xf32>
    %c2_20 = arith.constant 2 : index
    %c0_21 = arith.constant 0 : index
    %80 = memref.load %arg3[%c2_20, %c0_21] : memref<4x4xf32, #tpu.memory_space<smem>>
    %81 = vector.broadcast %80 : f32 to vector<1x256xf32>
    %82 = arith.mulf %81, %21 : vector<1x256xf32>
    %c2_22 = arith.constant 2 : index
    %c1_23 = arith.constant 1 : index
    %83 = memref.load %arg3[%c2_22, %c1_23] : memref<4x4xf32, #tpu.memory_space<smem>>
    %84 = vector.broadcast %83 : f32 to vector<1x256xf32>
    %85 = arith.mulf %84, %26 : vector<1x256xf32>
    %86 = arith.addf %82, %85 : vector<1x256xf32>
    %c2_24 = arith.constant 2 : index
    %c2_25 = arith.constant 2 : index
    %87 = memref.load %arg3[%c2_24, %c2_25] : memref<4x4xf32, #tpu.memory_space<smem>>
    %88 = vector.broadcast %87 : f32 to vector<1x256xf32>
    %89 = arith.mulf %88, %31 : vector<1x256xf32>
    %90 = arith.addf %86, %89 : vector<1x256xf32>
    %c2_26 = arith.constant 2 : index
    %c3_27 = arith.constant 3 : index
    %91 = memref.load %arg3[%c2_26, %c3_27] : memref<4x4xf32, #tpu.memory_space<smem>>
    %92 = vector.broadcast %91 : f32 to vector<1x256xf32>
    %93 = arith.mulf %92, %36 : vector<1x256xf32>
    %94 = arith.addf %90, %93 : vector<1x256xf32>
    %95 = arith.index_cast %arg0 : i32 to index
    %c4 = arith.constant 4 : index
    %96 = memref.load %arg2[%95, %c4] : memref<2x6xf32, #tpu.memory_space<smem>>
    %97 = vector.broadcast %96 : f32 to vector<1x256xf32>
    %98 = arith.addf %94, %97 : vector<1x256xf32>
    %99 = arith.subf %98, %15 : vector<1x256xf32>
    %100 = arith.mulf %99, %99 : vector<1x256xf32>
    %101 = arith.addf %79, %100 : vector<1x256xf32>
    %c3_28 = arith.constant 3 : index
    %c0_29 = arith.constant 0 : index
    %102 = memref.load %arg3[%c3_28, %c0_29] : memref<4x4xf32, #tpu.memory_space<smem>>
    %103 = vector.broadcast %102 : f32 to vector<1x256xf32>
    %104 = arith.mulf %103, %21 : vector<1x256xf32>
    %c3_30 = arith.constant 3 : index
    %c1_31 = arith.constant 1 : index
    %105 = memref.load %arg3[%c3_30, %c1_31] : memref<4x4xf32, #tpu.memory_space<smem>>
    %106 = vector.broadcast %105 : f32 to vector<1x256xf32>
    %107 = arith.mulf %106, %26 : vector<1x256xf32>
    %108 = arith.addf %104, %107 : vector<1x256xf32>
    %c3_32 = arith.constant 3 : index
    %c2_33 = arith.constant 2 : index
    %109 = memref.load %arg3[%c3_32, %c2_33] : memref<4x4xf32, #tpu.memory_space<smem>>
    %110 = vector.broadcast %109 : f32 to vector<1x256xf32>
    %111 = arith.mulf %110, %31 : vector<1x256xf32>
    %112 = arith.addf %108, %111 : vector<1x256xf32>
    %c3_34 = arith.constant 3 : index
    %c3_35 = arith.constant 3 : index
    %113 = memref.load %arg3[%c3_34, %c3_35] : memref<4x4xf32, #tpu.memory_space<smem>>
    %114 = vector.broadcast %113 : f32 to vector<1x256xf32>
    %115 = arith.mulf %114, %36 : vector<1x256xf32>
    %116 = arith.addf %112, %115 : vector<1x256xf32>
    %117 = arith.index_cast %arg0 : i32 to index
    %c5 = arith.constant 5 : index
    %118 = memref.load %arg2[%117, %c5] : memref<2x6xf32, #tpu.memory_space<smem>>
    %119 = vector.broadcast %118 : f32 to vector<1x256xf32>
    %120 = arith.addf %116, %119 : vector<1x256xf32>
    %121 = arith.subf %120, %16 : vector<1x256xf32>
    %122 = arith.mulf %121, %121 : vector<1x256xf32>
    %123 = arith.addf %101, %122 : vector<1x256xf32>
    %c0_36 = arith.constant 0 : index
    %c0_37 = arith.constant 0 : index
    %124 = vector.load %arg6[%c0_36, %c0_37] : memref<1x256xf32, #tpu.memory_space<vmem>>, vector<1x256xf32>
    %125 = arith.addf %124, %123 : vector<1x256xf32>
    %c0_38 = arith.constant 0 : index
    %c0_39 = arith.constant 0 : index
    %126 = vector.load %arg6[%c0_38, %c0_39] : memref<1x256xf32, #tpu.memory_space<vmem>>, vector<1x256xf32>
    tpu.vector_store %arg6[%c0_38, %c0_39], %125 {strides = array<i32>} : memref<1x256xf32, #tpu.memory_space<vmem>>, vector<1x256xf32>,
    %c0_i32_40 = arith.constant 0 : i32
    %127 = arith.cmpi eq, %arg1, %c0_i32_40 : i32
    %128 = arith.extui %127 : i1 to i32
    %c0_i32_41 = arith.constant 0 : i32
    %129 = arith.cmpi ne, %128, %c0_i32_41 : i32
    scf.if %129 {
      %c0_42 = arith.constant 0 : index
      %c0_43 = arith.constant 0 : index
      %130 = vector.load %arg6[%c0_42, %c0_43] : memref<1x256xf32, #tpu.memory_space<vmem>>, vector<1x256xf32>
      %131 = vector.shape_cast %130 : vector<1x256xf32> to vector<1x1x256xf32>
      %cst = arith.constant dense<0.000000e+00> : vector<1xf32>
      %132 = vector.multi_reduction <add>, %131, %cst [1, 2] : vector<1x1x256xf32> to vector<1xf32>
      %133 = vector.shape_cast %132 : vector<1xf32> to vector<1x1x1xf32>
      %134 = vector.extract %133[0, 0, 0] : f32 from vector<1x1x1xf32>
      %135 = vector.broadcast %134 : f32 to vector<1x8x128xf32>
      %c0_44 = arith.constant 0 : index
      %c0_45 = arith.constant 0 : index
      %c0_46 = arith.constant 0 : index
      %136 = vector.load %arg5[%c0_44, %c0_45, %c0_46] : memref<1x8x128xf32, #tpu.memory_space<vmem>>, vector<1x8x128xf32>
      tpu.vector_store %arg5[%c0_44, %c0_45, %c0_46], %135 {strides = array<i32>} : memref<1x8x128xf32, #tpu.memory_space<vmem>>, vector<1x8x128xf32>,
    } else {
    }
    return
  }
  func.func @transform_0(%arg0: i32, %arg1: i32) -> (i32, i32) {
    %c0_i32 = arith.constant 0 : i32
    %c0_i32_0 = arith.constant 0 : i32
    %c0_i32_1 = arith.constant 0 : i32
    return %c0_i32, %c0_i32_0 : i32, i32
  }
  func.func @transform_1(%arg0: i32, %arg1: i32) -> (i32, i32) {
    %c0_i32 = arith.constant 0 : i32
    %c0_i32_0 = arith.constant 0 : i32
    %c0_i32_1 = arith.constant 0 : i32
    return %c0_i32, %c0_i32_0 : i32, i32
  }
  func.func @transform_2(%arg0: i32, %arg1: i32) -> (i32, i32, i32) {
    %c0_i32 = arith.constant 0 : i32
    %c0_i32_0 = arith.constant 0 : i32
    return %arg0, %c0_i32, %arg1 : i32, i32, i32
  }
  func.func @transform_3(%arg0: i32, %arg1: i32) -> (i32, i32, i32) {
    %c0_i32 = arith.constant 0 : i32
    %c0_i32_0 = arith.constant 0 : i32
    %c0_i32_1 = arith.constant 0 : i32
    return %arg0, %c0_i32, %c0_i32_0 : i32, i32, i32
  }
}

</mosaic_0001>

<bundles_post_ra>
// kernel: tpu_custom_call.1
= control target key start
LH: loop header
LB: loop body
LE: loop exit
PB: predicated region body
PF: predicated region fallthrough
CT: control target
= control target key end

     0   :  { %8 = vsyncpa [#allocation6], 0  ;;  %s1326_s0 = inlined_call_operand.hbm [shape: f32[2,6], index: 0, kind: input, shape index: {}]   ;;  %s1327_s1 = inlined_call_operand.hbm [shape: f32[4,4], index: 1, kind: input, shape index: {}]   ;;  %s1328_s2 = inlined_call_operand.hbm [shape: f32[2,8,256], index: 2, kind: input, shape index: {}]   ;;  %s1329_s3 = inlined_call_operand.hbm [shape: f32[2,8,128], index: 3, kind: output, shape index: {}]  }
   0x1   :  { %9 = vsyncpa [#allocation8], 0 }
   0x2   :  { %10 = vsyncpa [#allocation4], 0 }
   0x3   :  { %12 = vsyncpa [#allocation4 + $0x1], 0 }
   0x4   :  { %13 = vsyncpa [#allocation5], 0 }
   0x5   :  { %15 = vsyncpa [#allocation5 + $0x1], 0  ;;  %s944_s12 = smov 0   ;;  %s946_s13 = smov 0  }
   0x6   :  { %s948_s14 = smov 0   ;;  %s950_s15 = smov 0  }
   0x7   :  { %s952_s16 = smov 0   ;;  %s954_s17 = smov 0  }
   0x8 LB: > { %s648_s18 = sadd.s32 4294967295, %s916_s17   ;;  %s649_s19 = sadd.s32 4294967294, %s916_s17   ;;  %s916_s17 = sphi %s954_s17, %s21_s17   ;;  %s912_s16 = sphi %s952_s16, %s1356_s16   ;;  %s908_s15 = sphi %s950_s15, %s1355_s15   ;;  %s904_s14 = sphi %s948_s14, %s1354_s14   ;;  %s900_s13 = sphi %s946_s13, %s1353_s13   ;;  %s896_s12 = sphi %s944_s12, %s1352_s12  }
   0x9   : > { %p97_p0 = scmp.ne.s32.totalorder %s900_s13, %s896_s12  ;;  %p978_p1 = scmp.eq.s32.totalorder %s648_s18, 0 }
   0xa   : > { %p982_p2 = scmp.eq.s32.totalorder %s648_s18, 1  ;;  %p127_p3 = scmp.eq.s32.totalorder %s649_s19, 1 }
   0xb   : > { %s1334_s20 = scalar_select %p978_p1, 1, 0 }
   0xc   : > { %p988_p4 = por %p978_p1, %p97_p0  ;;  %p650_p5 = scmp.ge.s32.totalorder %s916_s17, 1 }
   0xd   : > { %p993_p6 = por %p127_p3, %p97_p0  ;;  %p134_p7 = scmp.lt.s32.totalorder %s916_s17, 3 }
   0xe   : > { %s1336_s22 = scalar_select %p988_p4, 1, 0 }
   0xf   : > { %s1337_s23 = scalar_select %p993_p6, 1, 0 }
  0x10   : > { %p998_p8 = pnand %p650_p5, %p134_p7  ;;  %s33_s26 = sadd.s32 1, %s912_s16 }
  0x11   : > { %p1012_p12 = scmp.ge.s32.totalorder %s33_s26, 2  ;;  %s84_s28 = sadd.s32 1, %s904_s14 }
  0x12   : > { %p697_p10 = pneg %p998_p8  ;;  %s770_s4 = scalar_lea.hbm %s1326_s0, 32 }
  0x13   : > { %p771_p0 = scmp.ne.s32.totalorder %s1326_s0, %s770_s4 }
  0x14   : > { %p1007_p11 = pnand %p697_p10, %p978_p1  ;;  %p777_p10 = scmp.lt.u32.totalorder %s770_s4, %s1326_s0 }
  0x16   : > { %p772_p3 = pneg %p1007_p11 }
  0x18   : > { %p773_p5 = pnand %p772_p3, %p771_p0 }
  0x1a   : > { %p774_p7 = pneg %p773_p5 }
  0x1c   : > { %p779_p9 = pnand %p777_p10, %p774_p7 }
  0x1e   : > { %782 = shalt.err (!%p779_p9)
}
  0x1f   : > { %s918_s9 = smov [#allocation3]   ;;  %s783_s29 = scalar_lea.hbm %s1327_s1, 64 }
  0x20   : > { %700 = dma.hbm_to_smem (!%p1007_p11), %s1326_s0, 32, %s918_s9, [#allocation6]  }
  0x21   : > { %p784_p0 = scmp.ne.s32.totalorder %s1327_s1, %s783_s29  ;;  %p790_p9 = scmp.lt.u32.totalorder %s783_s29, %s1327_s1 }
  0x23   : > { %p786_p5 = pnand %p784_p0, %p772_p3 }
  0x25   : > { %p787_p13 = pneg %p786_p5 }
  0x27   : > { %p792_p7 = pnand %p790_p9, %p787_p13 }
  0x29   : > { %795 = shalt.err (!%p792_p7)
}
  0x2a   : > { %s919_s7 = smov [#allocation7]   ;;  %s1358_s26 = smov (%p1012_p12, %s33_s26), 0 }
  0x2b   : > { %703 = dma.hbm_to_smem (!%p1007_p11), %s1327_s1, 64, %s919_s7, [#allocation8]  }
  0x2c   : > { %p92_p13 = scmp.eq.s32.totalorder %s916_s17, 0  ;;  %p1341_p3 = scmp.ne.s32.totalorder %s904_s14, %s900_s13 }
  0x2d   : > { %s79_s10 = ssub.s32 %s912_s16, %s1358_s26  ;;  %p714_p0 = scmp.lt.s32.totalorder %s916_s17, 2 }
  0x2e   : > { %p1059_p10 = por %p982_p2, %p1341_p3  ;;  %p82_p5 = scmp.eq.s32.totalorder %s79_s10, 0 }
  0x2f   : > { %p1343_p9 = pmov %p1341_p3  ;;  %s165_s11 = sand.u32 1, %s904_s14  }
  0x30   : > { %s1342_s25 = scalar_select %p1059_p10, 1, 0 }
  0x31   : > { %p93_p7 = por %p92_p13, %p1343_p9  ;;  %s682_s18 = sshll.u32 %s912_s16, 8 }
  0x32   : > { %s1074_s19 = scalar_select %p82_p5, %s904_s14, %s84_s28  }
  0x33   : > { %s654_s27 = sshll.u32 %s165_s11, 4  ;;  %s1079_s5 = scalar_lea.hbm %s1328_s2, %s682_s18 }
  0x34   : > { %s169_s21 = scalar_lea.vmem [#allocation9], %s654_s27  ;;  %p1081_p2 = pnand %p714_p0, %p93_p7 }
  0x35   : > { %s179_s4 = sshll.u32 %s169_s21, 4  ;;  %s166_s28 = scalar_lea.sflag [#allocation4], %s165_s11  ;;  %s1085_s4 = int_to_ptr.vmem [resolvable:$true] %s179_s4 }
  0x36   : > { %s796_s7 = scalar_lea.hbm %s1079_s5, 256  ;;  %p798_p12 = pneg %p1081_p2 }
  0x37   : > { %p797_p11 = scmp.ne.s32.totalorder %s1079_s5, %s796_s7  ;;  %s801_s10 = scalar_lea.hbm %s1328_s2, 512 }
  0x38   : > { %p802_p0 = scmp.lt.u32.totalorder %s1079_s5, %s1328_s2  ;;  %p803_p5 = scmp.lt.u32.totalorder %s801_s10, %s796_s7 }
  0x39   : > { %p799_p13 = pnand %p798_p12, %p797_p11  ;;  %p805_p7 = scmp.lt.u32.totalorder %s796_s7, %s1079_s5 }
  0x3a   : > { %p804_p9 = por %p803_p5, %p802_p0 }
  0x3b   : > { %p800_p3 = pneg %p799_p13 }
  0x3c   : > { %p806_p6 = por %p805_p7, %p804_p9 }
  0x3e   : > { %p807_p10 = pnand %p806_p6, %p800_p3 }
  0x40   : > { %810 = shalt.err (!%p807_p10)
}
  0x41   : > { %s811_s11 = scalar_lea.vmem %s1085_s4, 256  ;;  %s920_s29 = smov [#allocation9]  }
  0x42   : > { %p812_p11 = scmp.ne.s32.totalorder %s1085_s4, %s811_s11  ;;  %s816_s30 = sshll.u32 %s920_s29, 4  ;;  %s817_s30 = int_to_ptr.vmem [resolvable:$false] %s816_s30 }
  0x43   : > { %s818_s21 = scalar_lea.vmem %s817_s30, 512  ;;  %p819_p1 = scmp.lt.s32.totalorder %s1085_s4, %s817_s30 }
  0x44   : > { %p814_p13 = pnand %p812_p11, %p798_p12  ;;  %p820_p0 = scmp.lt.s32.totalorder %s818_s21, %s811_s11 }
  0x46   : > { %p815_p4 = pneg %p814_p13  ;;  %p821_p5 = por %p820_p0, %p819_p1 }
  0x48   : > { %p822_p9 = pnand %p821_p5, %p815_p4 }
  0x4a   : > { %825 = shalt.err (!%p822_p9)
}
  0x4b   : > { %707 = dma.hbm_to_vmem [thread:$0]  (!%p1081_p2), %s1079_s5, 256, %s1085_s4, %s166_s28  }
  0x4c   : > { %188 = sbr.rel (%p998_p8) target bundleno = 385 (0x181), region = 32  ;;  %p1345_p6 = scmp.ne.s32.totalorder (!%p998_p8), %s1334_s20, 0 }
  0x53   : > { %879 = dma.done.wait (%p1345_p6), [#allocation6], 32  }
  0x54   : > { %881 = vsyncadd (%p1345_p6), [#allocation6], 4294967264 }
  0x55   : > { %883 = dma.done.wait (%p1345_p6), [#allocation8], 64  }
  0x56   : > { %885 = vsyncadd (%p1345_p6), [#allocation8], 4294967232  ;;  %s1123_s6 = sand.u32 1, %s900_s13   ;;  %p1346_p1 = scmp.ne.s32.totalorder %s1336_s22, 0 }
  0x57   : > { %s660_s24 = sshll.u32 %s1123_s6, 4  ;;  %s199_s5 = scalar_lea.sflag [#allocation4], %s1123_s6 }
  0x58   : > { %s202_s4 = scalar_lea.vmem [#allocation9], %s660_s24 }
  0x59   : > { %887 = dma.done.wait (%p1346_p1), %s199_s5, 256  }
  0x5a   : > { %889 = vsyncadd (%p1346_p1), %s199_s5, 4294967040 }
  0x5b   : > { %207 = sfence }
  0x5c   : > { %v231_v0 = vlaneseq  ;;  %s1132_s28 = sshll.u32 %s908_s15, 7  ;;  %s1134_s20 = sld [smem:[#allocation7]]  ;;  %v921_v2 = vmov 0.0   ;;  %v1158_v3 = vld [vmem:[%s202_s4] sm:$0xff]  ;;  %v1160_v4 = vld [vmem:[%s202_s4 + $0x8] sm:$0xff]  ;;  %vm516_vm1 = vcmask 1040384  }
  0x5d   : > { %s237_s7 = sld [smem:[#allocation3 + %s1132_s28]]  ;;  %s238_s8 = sadd.s32 1, %s1132_s28  ;;  %v303_v11 = vrot.slane %v1158_v3, 4  ;;  %v304_v12 = vrot.slane %v1160_v4, 4  ;;  %v356_v13 = vrot.slane %v1158_v3, 5  ;;  %v357_v14 = vrot.slane %v1160_v4, 5 }
  0x5e   : > { %vm1139_vm0 = vcmp.lt.s32.totalorder %v231_v0, 256  ;;  %s239_s9 = sld [smem:[#allocation3 + %s238_s8]]  ;;  %s296_s18 = sadd.s32 2, %s1132_s28  ;;  %v411_v18 = vrot.slane %v1158_v3, 6 }
  0x5f   : > { %s1143_s22 = sld [smem:[#allocation7 + $0x1]]  ;;  %235 = vst.msk [vmem:[#allocation2] sm:$0x3] %vm1139_vm0, %v921_v2  ;;  %s1147_s15 = sld [smem:[#allocation7 + $0x2]] }
  0x60   : > { %s1149_s10 = sld [smem:[#allocation7 + $0x3]]  ;;  %s1152_s27 = sld [smem:[#allocation7 + $0x80]] }
  0x61   : > { %s1154_s11 = sld [smem:[#allocation3 + %s296_s18]]  ;;  %s351_s4 = sadd.s32 3, %s1132_s28 }
  0x62   : > { %s1156_s29 = sld [smem:[#allocation7 + $0x81]]  ;;  %s1162_s30 = sld [smem:[#allocation7 + $0x82]]  ;;  %v257_v17 = vstv %s1134_s20 }
  0x63   : > { %s1164_s21 = sld [smem:[#allocation7 + $0x83]]  ;;  %v242_v5 = vstv %s237_s7  ;;  %s1166_s24 = sld [smem:[#allocation7 + $0x100]] }
  0x64   : > { %v245_v6 = vstv %s239_s9  ;;  %s1168_s5 = sld [smem:[#allocation7 + $0x101]]  ;;  %v243_v7 = vmul.f32 %v242_v5, %v1158_v3  ;;  %v244_v8 = vmul.f32 %v242_v5, %v1160_v4  ;;  %s1207_s7 = sld [smem:[#allocation7 + $0x102]] }
  0x65   : > { %v246_v9 = vmul.f32 %v245_v6, %v1158_v3  ;;  %v247_v10 = vmul.f32 %v245_v6, %v1160_v4  ;;  %v261_v19 = vstv %s1143_s22  ;;  %v273_v20 = vstv %s1147_s15  ;;  %s1205_s20 = sld [smem:[#allocation3 + %s351_s4]]  ;;  %s406_s9 = sadd.s32 4, %s1132_s28 }
  0x66   : > { %v285_v21 = vstv %s1149_s10  ;;  %v312_v22 = vstv %s1152_s27  ;;  %s1211_s8 = sld [smem:[#allocation7 + $0x103]]  ;;  %s1218_s22 = sld [smem:[#allocation7 + $0x180]] }
  0x67   : > { %v250_v15 = vrot.slane %v246_v9, 4  ;;  %v251_v16 = vrot.slane %v247_v10, 4  ;;  %v298_v25 = vstv %s1154_s11  ;;  %s1224_s15 = sld [smem:[#allocation3 + %s406_s9]]  ;;  %s461_s11 = sadd.s32 5, %s1132_s28 }
  0x68   : > { %v316_v26 = vstv %s1156_s29  ;;  %v328_v27 = vstv %s1162_s30  ;;  %s1228_s10 = sld [smem:[#allocation7 + $0x181]]  ;;  %s1230_s18 = sld [smem:[#allocation7 + $0x182]] }
  0x69   : > { %v1184_v23 = vadd.f32 %v250_v15, %v243_v7  ;;  %v1186_v24 = vadd.f32 %v251_v16, %v244_v8  ;;  %v340_v28 = vstv %s1164_s21  ;;  %v367_v29 = vstv %s1166_s24  ;;  %s1240_s27 = sld [smem:[#allocation7 + $0x183]]  ;;  %s661_s30 = sshll.u32 %s1123_s6, 3 }
  0x6a   : > { %v371_v30 = vstv %s1168_s5  ;;  %s1253_s29 = sld [smem:[#allocation3 + %s461_s11]]  ;;  %s225_s21 = scalar_lea.vmem [#allocation10], %s661_s30 }
  0x6b   : > { %v258_v31 = vmul.f32 %v257_v17, %v1184_v23  ;;  %v259_v32 = vmul.f32 %v257_v17, %v1186_v24  ;;  %v262_v33 = vmul.f32 %v261_v19, %v1184_v23  ;;  %v263_v34 = vmul.f32 %v261_v19, %v1186_v24  ;;  %s545_s24 = sshll.u32 %s225_s21, 4  ;;  %p1349_p8 = scmp.ne.s32.totalorder %s1342_s25, 0  ;;  %s1273_s24 = int_to_ptr.vmem [resolvable:$true] %s545_s24 }
  0x6c   : > { %v274_v35 = vmul.f32 %v273_v20, %v1184_v23  ;;  %v275_v36 = vmul.f32 %v273_v20, %v1186_v24  ;;  %v286_v37 = vmul.f32 %v285_v21, %v1184_v23  ;;  %v287_v38 = vmul.f32 %v285_v21, %v1186_v24  ;;  %s826_s9 = scalar_lea.vmem %s1273_s24, 128 }
  0x6d   : > { %v266_v39 = vrot.slane %v262_v33, 1  ;;  %v267_v40 = vrot.slane %v263_v34, 1  ;;  %v313_v41 = vmul.f32 %v312_v22, %v1184_v23  ;;  %v314_v42 = vmul.f32 %v312_v22, %v1186_v24  ;;  %p827_p4 = scmp.ne.s32.totalorder %s1273_s24, %s826_s9 }
  0x6e   : > { %v278_v43 = vrot.slane %v274_v35, 2  ;;  %v279_v44 = vrot.slane %v275_v36, 2  ;;  %v290_v45 = vrot.slane %v286_v37, 3  ;;  %v291_v46 = vrot.slane %v287_v38, 3 }
  0x6f   : > { %v270_v47 = vadd.f32 %v266_v39, %v258_v31  ;;  %v271_v48 = vadd.f32 %v267_v40, %v259_v32  ;;  %v317_v49 = vmul.f32 %v316_v26, %v1184_v23  ;;  %v318_v50 = vmul.f32 %v316_v26, %v1186_v24  ;;  %p828_p10 = pnand %p827_p4, %p1349_p8 }
  0x70   : > { %v329_v51 = vmul.f32 %v328_v27, %v1184_v23  ;;  %v330_v52 = vmul.f32 %v328_v27, %v1186_v24  ;;  %v341_v53 = vmul.f32 %v340_v28, %v1184_v23  ;;  %v342_v54 = vmul.f32 %v340_v28, %v1186_v24 }
  0x71   : > { %v282_v55 = vadd.f32 %v278_v43, %v270_v47  ;;  %v283_v56 = vadd.f32 %v279_v44, %v271_v48  ;;  %v321_v57 = vrot.slane %v317_v49, 1  ;;  %v322_v58 = vrot.slane %v318_v50, 1  ;;  %p829_p2 = pneg %p828_p10 }
  0x72   : > { %v333_v59 = vrot.slane %v329_v51, 2  ;;  %v334_v60 = vrot.slane %v330_v52, 2  ;;  %v345_v61 = vrot.slane %v341_v53, 3  ;;  %v346_v62 = vrot.slane %v342_v54, 3 }
  0x73   : > { %v294_v63 = vadd.f32 %v290_v45, %v282_v55  ;;  %v295_v2 = vadd.f32 %v291_v46, %v283_v56  ;;  %v325_v5 = vadd.f32 %v321_v57, %v313_v41  ;;  %v326_v6 = vadd.f32 %v322_v58, %v314_v42 }
  0x74   : > { %v368_v7 = vmul.f32 %v367_v29, %v1184_v23  ;;  %v369_v8 = vmul.f32 %v367_v29, %v1186_v24  ;;  %v372_v9 = vmul.f32 %v371_v30, %v1184_v23  ;;  %v373_v10 = vmul.f32 %v371_v30, %v1186_v24 }
  0x75   : > { %v299_v15 = vadd.f32 %v298_v25, %v294_v63  ;;  %v300_v16 = vadd.f32 %v298_v25, %v295_v2  ;;  %v337_v17 = vadd.f32 %v333_v59, %v325_v5  ;;  %v338_v19 = vadd.f32 %v334_v60, %v326_v6 }
  0x76   : > { %v353_v20 = vstv %s1205_s20  ;;  %v376_v21 = vrot.slane %v372_v9, 1  ;;  %v377_v22 = vrot.slane %v373_v10, 1  ;;  %v383_v26 = vstv %s1207_s7  ;;  %s1279_s7 = scalar_lea.hbm %s1329_s3, %s1132_s28 }
  0x77   : > { %v307_v27 = vsub.f32 %v299_v15, %v303_v11  ;;  %v349_v28 = vadd.f32 %v345_v61, %v337_v17  ;;  %v350_v29 = vadd.f32 %v346_v62, %v338_v19  ;;  %v395_v30 = vstv %s1211_s8  ;;  %s532_s8 = scalar_lea.sflag [#allocation5], %s1123_s6 }
  0x78   : > { %v380_v25 = vadd.f32 %v376_v21, %v368_v7  ;;  %v381_v31 = vadd.f32 %v377_v22, %v369_v8  ;;  %v384_v32 = vmul.f32 %v383_v26, %v1184_v23  ;;  %v385_v33 = vmul.f32 %v383_v26, %v1186_v24 }
  0x79   : > { %v308_v34 = vsub.f32 %v300_v16, %v304_v12  ;;  %v354_v35 = vadd.f32 %v353_v20, %v349_v28  ;;  %v355_v36 = vadd.f32 %v353_v20, %v350_v29  ;;  %v412_v37 = vrot.slane %v1160_v4, 6 }
  0x7a   : > { %v388_v11 = vrot.slane %v384_v32, 2  ;;  %v389_v38 = vrot.slane %v385_v33, 2  ;;  %v396_v39 = vmul.f32 %v395_v30, %v1184_v23  ;;  %v397_v40 = vmul.f32 %v395_v30, %v1186_v24 }
  0x7b   : > { %v309_v41 = vmul.f32 %v307_v27, %v307_v27  ;;  %v360_v42 = vsub.f32 %v354_v35, %v356_v13  ;;  %v422_v12 = vstv %s1218_s22  ;;  %v310_v47 = vmul.f32 %v308_v34, %v308_v34  ;;  %s923_s22 = smov [#allocation10]  }
  0x7c   : > { %v392_v43 = vadd.f32 %v388_v11, %v380_v25  ;;  %v393_v44 = vadd.f32 %v389_v38, %v381_v31  ;;  %v400_v45 = vrot.slane %v396_v39, 3  ;;  %v401_v46 = vrot.slane %v397_v40, 3 }
  0x7d   : > { %v361_v48 = vsub.f32 %v355_v36, %v357_v14  ;;  %v362_v49 = vmul.f32 %v360_v42, %v360_v42  ;;  %v408_v50 = vstv %s1224_s15  ;;  %v426_v53 = vstv %s1228_s10  ;;  %s830_s15 = sshll.u32 %s923_s22, 4  ;;  %s831_s15 = int_to_ptr.vmem [resolvable:$false] %s830_s15 }
  0x7e   : > { %v404_v51 = vadd.f32 %v400_v45, %v392_v43  ;;  %v405_v52 = vadd.f32 %v401_v46, %v393_v44  ;;  %v438_v54 = vstv %s1230_s18  ;;  %v423_v13 = vmul.f32 %v422_v12, %v1184_v23  ;;  %v476_v43 = vld [vmem:[#allocation2] sm:$0x3]  ;;  %s832_s10 = scalar_lea.vmem %s831_s15, 256  ;;  %p833_p12 = scmp.lt.s32.totalorder %s1273_s24, %s831_s15 }
  0x7f   : > { %v424_v55 = vmul.f32 %v422_v12, %v1186_v24  ;;  %v427_v56 = vmul.f32 %v426_v53, %v1184_v23  ;;  %v428_v57 = vmul.f32 %v426_v53, %v1186_v24  ;;  %v439_v14 = vmul.f32 %v438_v54, %v1184_v23  ;;  %p834_p3 = scmp.lt.s32.totalorder %s832_s10, %s826_s9 }
  0x80   : > { %v409_v58 = vadd.f32 %v408_v50, %v404_v51  ;;  %v410_v59 = vadd.f32 %v408_v50, %v405_v52  ;;  %v440_v60 = vmul.f32 %v438_v54, %v1186_v24  ;;  %v363_v61 = vmul.f32 %v361_v48, %v361_v48 }
  0x81   : > { %v431_v62 = vrot.slane %v427_v56, 1  ;;  %v432_v63 = vrot.slane %v428_v57, 1  ;;  %v450_v2 = vstv %s1240_s27  ;;  %v443_v7 = vrot.slane %v439_v14, 2  ;;  %p835_p7 = por %p834_p3, %p833_p12 }
  0x82   : > { %v415_v5 = vsub.f32 %v409_v58, %v411_v18  ;;  %v416_v6 = vsub.f32 %v410_v59, %v412_v37  ;;  %v444_v8 = vrot.slane %v440_v60, 2  ;;  %v451_v15 = vmul.f32 %v450_v2, %v1184_v23 }
  0x83   : > { %v435_v9 = vadd.f32 %v431_v62, %v423_v13  ;;  %v436_v10 = vadd.f32 %v432_v63, %v424_v55  ;;  %v452_v16 = vmul.f32 %v450_v2, %v1186_v24  ;;  %v466_v17 = vrot.slane %v1158_v3, 7  ;;  %p836_p11 = pnand %p835_p7, %p829_p2 }
  0x84   : > { %v467_v19 = vrot.slane %v1160_v4, 7  ;;  %v455_v22 = vrot.slane %v451_v15, 3  ;;  %v364_v27 = vadd.f32 %v362_v49, %v309_v41  ;;  %v365_v18 = vadd.f32 %v363_v61, %v310_v47 }
  0x85   : > { %v447_v20 = vadd.f32 %v443_v7, %v435_v9  ;;  %v448_v21 = vadd.f32 %v444_v8, %v436_v10  ;;  %v456_v26 = vrot.slane %v452_v16, 3  ;;  %v463_v28 = vstv %s1253_s29 }
  0x86   : > { %v922_v29 = vmov 1966171168   ;;  %v417_v25 = vmul.f32 %v415_v5, %v415_v5  ;;  %v418_v31 = vmul.f32 %v416_v6, %v416_v6  ;;  %v484_v3 = vshrl.u32 %v231_v0, 7 }
  0x87   : > { %v481_v30 = vunpack.c.l.s4 %v922_v29  ;;  %v459_v32 = vadd.f32 %v455_v22, %v447_v20  ;;  %v460_v33 = vadd.f32 %v456_v26, %v448_v21 }
  0x88   : > { %v419_v35 = vadd.f32 %v417_v25, %v364_v27  ;;  %v420_v4 = vadd.f32 %v418_v31, %v365_v18  ;;  %v508_v46 = vsub.s32 0, %v484_v3  ;;  %v512_v47 = vsub.s32 1, %v484_v3 }
  0x89   : > { %v464_v23 = vadd.f32 %v463_v28, %v459_v32  ;;  %v465_v34 = vadd.f32 %v463_v28, %v460_v33  ;;  %v482_v24 = vunpack.c.0.s8 %v481_v30 }
  0x8b   : > { %v470_v36 = vsub.f32 %v464_v23, %v466_v17  ;;  %v471_v37 = vsub.f32 %v465_v34, %v467_v19  ;;  %v485_v41 = vsub.s32 %v482_v24, %v484_v3 }
  0x8d   : > { %v472_v11 = vmul.f32 %v470_v36, %v470_v36  ;;  %v473_v38 = vmul.f32 %v471_v37, %v471_v37 }
  0x8f   : > { %v474_v39 = vadd.f32 %v472_v11, %v419_v35  ;;  %v475_v40 = vadd.f32 %v473_v38, %v420_v4 }
  0x91   : > { %v479_v42 = vcombine.low %v474_v39, %v475_v40 }
  0x93   : > { %v486_v12 = vrot.slane %v479_v42, %v485_v41 }
  0x95   : > { %v493_v44 = vrot.slane %v486_v12, %v485_v41 }
  0x97   : > { %v495_v45 = vadd.f32 %v493_v44, %v476_v43 }
  0x99   : > { %500 = vst.msk [vmem:[#allocation2] sm:$0x3] %vm1139_vm0, %v495_v45 }
  0xa0   : > { %v504_v0 = vld [vmem:[#allocation2] sm:$0x3] }
  0xa1   : > { %v509_v48 = vrot.slane %v504_v0, %v508_v46  ;;  %v513_v49 = vrot.slane %v504_v0, %v512_v47 }
  0xa3   : > { %v517_v50 = vsel %vm516_vm1, %v509_v48, 0.0  ;;  %v518_v51 = vsel %vm516_vm1, %v513_v49, 0.0 }
  0xa4   : > { %v519_v52 = vadd.f32 %v518_v51, %v517_v50 }
  0xa6   : > { %520 = vadd.xlane.f32.xlu0 %v519_v52 }
 0x133   : > { %v521_v53 = vpop.xlane.xlu0 %520 }
 0x134   : > { %v522_v54 = vrot.slane %v521_v53, 4 }
 0x136   : > { %v523_v13 = vadd.f32 %v522_v54, %v521_v53 }
 0x138   : > { %v524_v55 = vrot.slane %v523_v13, 2 }
 0x13a   : > { %v525_v1 = vadd.f32 %v524_v55, %v523_v13 }
 0x13c   : > { %v526_v56 = vrot.slane %v525_v1, 1 }
 0x13e   : > { %v527_v57 = vadd.f32 %v526_v56, %v525_v1 }
 0x140   : > { %683 = vpush %v527_v57 }
 0x171   : > { %s684_s5 = spop %683 }
 0x172   : > { %v529_v58 = vstv %s684_s5 }
 0x173   : > { %530 = vst [vmem:[%s225_s21] sm:$0xff] %v529_v58 }
 0x174   : > { %839 = shalt.err (!%p836_p11)
}
 0x175   : > { %s840_s6 = scalar_lea.hbm %s1279_s7, 128  ;;  %s844_s27 = scalar_lea.hbm %s1329_s3, 256 }
 0x176   : > { %p841_p13 = scmp.ne.s32.totalorder %s1279_s7, %s840_s6  ;;  %p845_p9 = scmp.lt.u32.totalorder %s1279_s7, %s1329_s3 }
 0x177   : > { %p846_p6 = scmp.lt.u32.totalorder %s844_s27, %s840_s6  ;;  %p848_p4 = scmp.lt.u32.totalorder %s840_s6, %s1279_s7 }
 0x178   : > { %p842_p0 = pnand %p841_p13, %p1349_p8 }
 0x179   : > { %p847_p1 = por %p846_p6, %p845_p9 }
 0x17a   : > { %p843_p5 = pneg %p842_p0 }
 0x17b   : > { %p849_p10 = por %p848_p4, %p847_p1 }
 0x17d   : > { %p850_p2 = pnand %p849_p10, %p843_p5 }
 0x17f   : > { %853 = shalt.err (!%p850_p2)
}
 0x180   : > { %695 = dma.vmem_to_hbm [thread:$0]  (%p1349_p8), %s1273_s24, 128, %s1279_s7, %s532_s8  }
 0x181 PF: > { %s557_s30 = sand.u32 1, %s896_s12   ;;  %p1350_p12 = scmp.ne.s32.totalorder %s1337_s23, 0 }
 0x182   : > { %p1351_p3 = scmp.ge.s32.totalorder %s916_s17, 2  ;;  %s558_s21 = scalar_lea.sflag [#allocation5], %s557_s30 }
 0x184   : > { %p709_p7 = pnand %p1351_p3, %p1350_p12 }
 0x186   : > { %891 = dma.done.wait (!%p709_p7), %s558_s21, 128  }
 0x187   : > { %893 = vsyncadd (!%p709_p7), %s558_s21, 4294967168  ;;  %s21_s17 = sadd.s32 1, %s916_s17   ;;  %s1352_s12 = smov %s900_s13 }
 0x188   : > { %p18_p11 = scmp.ge.s32.totalorder %s21_s17, 4   ;;  %s1353_s13 = smov %s904_s14 }
 0x189   : > { %s1354_s14 = smov %s1074_s19  ;;  %s1355_s15 = smov %s912_s16 }
 0x18a   : > { %s1356_s16 = smov %s1358_s26  ;;  %20 = sbr.rel (!%p18_p11) target bundleno = 8 (0x8), region = 94 }
 0x191   :  { %563 = vsyncpa [#allocation4], 1 }
 0x192   :  { %565 = vsyncpa [#allocation4 + $0x1], 1 }
 0x193   :  { %566 = vsyncpa [#allocation5], 1 }
 0x194   :  { %568 = vsyncpa [#allocation5 + $0x1], 1 }
 0x195   :  { %569 = vsyncpa [#allocation6], 1 }
 0x196   :  { %571 = vsyncpa [#allocation6 + $0x1], 1 }
 0x197   :  { %572 = vsyncpa [#allocation8], 1 }

</bundles_post_ra>
